<compile_context>
chip_gen: v7x
topology: tpu7x:2x2x1
jax: 0.10.0
libtpu: 0.0.40
codegen_flags: <defaults>
</compile_context>

<pallas_src>
import functools

import jax
import jax.numpy as jnp
from jax.experimental import pallas as pl
from jax.experimental.pallas import tpu as pltpu

LANE = 128  # vreg lane width; batch maps to this axis


def _round_up(x, m):
    return (x + m - 1) // m * m


def dueling_net_kernel(xT_ref,
                       w1T_ref, b1_ref,
                       w23T_ref, b23_ref,
                       wheadT_ref, bhead_ref,
                       out_ref,
                       *, n_out):
    # x^T tile: (n_in, TB) f32 -> bf16 for the MXU
    xT = xT_ref[...].astype(jnp.bfloat16)

    # h1^T = relu(W1^T @ x^T + b1^T)               (n_mid, TB)
    h1 = jnp.maximum(
        jnp.dot(w1T_ref[...], xT, preferred_element_type=jnp.float32)
        + b1_ref[...], 0.0)

    # [h2^T ; h3^T] = relu(W23^T @ h1^T + b23^T)   (2*n_mid, TB), fused fc2/fc3
    h23 = jnp.maximum(
        jnp.dot(w23T_ref[...], h1.astype(jnp.bfloat16),
                preferred_element_type=jnp.float32)
        + b23_ref[...], 0.0)

    # fused head matmul: rows [:n_out] = adv^T (reads the h3 half),
    # row n_out = val^T (reads the h2 half), remaining rows are zero padding.
    head = (jnp.dot(wheadT_ref[...], h23.astype(jnp.bfloat16),
                    preferred_element_type=jnp.float32)
            + bhead_ref[...])

    adv = head[:n_out, :]                 # (n_out, TB)
    val = head[n_out:n_out + 1, :]        # (1, TB)

    # dueling mean over the real adv rows only (val / padded rows excluded)
    adv_mean = jnp.sum(adv, axis=0, keepdims=True) * (1.0 / n_out)

    out_ref[...] = (val + adv - adv_mean).astype(out_ref.dtype)


def prepare_params(params):
    """One-time parameter plumbing (hoisted out of the per-call path).

    Builds transposed, fused, bf16 weight slabs for the batch-on-lanes kernel.
    """
    n_in, n_mid = params["w1"].shape
    n_out = params["wadv"].shape[1]
    hr = _round_up(n_out + 1, 8)   # head rows: n_out adv rows + 1 val row, padded

    w1T = params["w1"].T.astype(jnp.bfloat16)                    # (n_mid, n_in)
    b1 = params["b1"].T                                          # (n_mid, 1) f32

    w23T = jnp.concatenate([params["w2"].T, params["w3"].T],
                           axis=0).astype(jnp.bfloat16)          # (2*n_mid, n_mid)
    b23 = jnp.concatenate([params["b2"].T, params["b3"].T], axis=0)  # (2*n_mid, 1)

    w_head = jnp.zeros((hr, 2 * n_mid), jnp.float32)
    w_head = w_head.at[:n_out, n_mid:].set(params["wadv"].T)     # adv <- h3 half
    w_head = w_head.at[n_out, :n_mid].set(params["wv"][:, 0])    # val <- h2 half
    w_headT = w_head.astype(jnp.bfloat16)                        # (hr, 2*n_mid)

    b_head = jnp.zeros((hr, 1), jnp.float32)
    b_head = b_head.at[:n_out, 0].set(params["badv"][0])
    b_head = b_head.at[n_out, 0].set(params["bv"][0, 0])

    return dict(w1T=w1T, b1=b1, w23T=w23T, b23=b23,
                w_headT=w_headT, b_head=b_head,
                n_in=n_in, n_mid=n_mid, n_out=n_out, hr=hr)


def dueling_net(x, prepped, *, tb=None):
    """x: (B, n_in) f32. prepped: output of prepare_params.

    Returns (B, n_out) f32, matching the PyTorch forward (up to bf16 MXU
    operand precision).
    """
    B, n_in = x.shape
    assert n_in == prepped["n_in"]
    n_out = prepped["n_out"]

    # ---- batch tiling (lane axis) -------------------------------------------
    if tb is None:
        # aim for >= 2 grid steps (v7x dual-TensorCore sharding) when possible,
        # multiple of 128 lanes, capped so double-buffered VMEM stays tiny.
        tb = _round_up(max(-(-B // 2), 1), LANE)
        tb = max(LANE, min(tb, 2048))
    assert tb % LANE == 0, "batch tile must be a multiple of 128 lanes"

    B_pad = _round_up(B, tb)
    xT = jnp.pad(x, ((0, B_pad - B), (0, 0))).T       # (n_in, B_pad)
    grid = (B_pad // tb,)

    resident = lambda a: pl.BlockSpec(a.shape, lambda i: (0,) * a.ndim)
    kernel = functools.partial(dueling_net_kernel, n_out=n_out)

    outT = pl.pallas_call(
        kernel,
        out_shape=jax.ShapeDtypeStruct((n_out, B_pad), jnp.float32),
        grid=grid,
        in_specs=[
            pl.BlockSpec((n_in, tb), lambda i: (0, i)),   # x^T: tiled over batch lanes
            resident(prepped["w1T"]), resident(prepped["b1"]),
            resident(prepped["w23T"]), resident(prepped["b23"]),
            resident(prepped["w_headT"]), resident(prepped["b_head"]),
        ],
        out_specs=pl.BlockSpec((n_out, tb), lambda i: (0, i)),
        compiler_params=pltpu.CompilerParams(
            dimension_semantics=("parallel",)),
    )(xT, prepped["w1T"], prepped["b1"], prepped["w23T"], prepped["b23"],
      prepped["w_headT"], prepped["b_head"])

    return outT[:, :B].T                               # (B, n_out)


def init_params(key, n_in, n_mid, n_out):
    """Deterministic synthetic init (uniform, PyTorch-Linear-like fan-in scale)."""
    def linear(key, fan_in, fan_out):
        kw, kb = jax.random.split(key)
        bound = 1.0 / jnp.sqrt(fan_in)
        # stored as (in, out) so the reference computes x @ W
        w = jax.random.uniform(kw, (fan_in, fan_out), jnp.float32, -bound, bound)
        b = jax.random.uniform(kb, (1, fan_out), jnp.float32, -bound, bound)
        return w, b

    ks = jax.random.split(key, 5)
    w1, b1 = linear(ks[0], n_in, n_mid)
    w2, b2 = linear(ks[1], n_mid, n_mid)
    w3, b3 = linear(ks[2], n_mid, n_mid)
    wadv, badv = linear(ks[3], n_mid, n_out)
    wv, bv = linear(ks[4], n_mid, 1)
    return dict(w1=w1, b1=b1, w2=w2, b2=b2, w3=w3, b3=b3,
                wadv=wadv, badv=badv, wv=wv, bv=bv)


def dueling_net_ref(x, p):
    """Pure-JAX f32 reference matching the PyTorch forward."""
    h1 = jax.nn.relu(x @ p["w1"] + p["b1"])
    h2 = jax.nn.relu(h1 @ p["w2"] + p["b2"])
    h3 = jax.nn.relu(h1 @ p["w3"] + p["b3"])
    adv = h3 @ p["wadv"] + p["badv"]
    val = h2 @ p["wv"] + p["bv"]
    return val + adv - jnp.mean(adv, axis=1, keepdims=True)


if __name__ == "__main__":
    key = jax.random.PRNGKey(0)
    k_x, k_x2, k_p = jax.random.split(key, 3)

    B, n_in, n_mid, n_out = 8, 16, 32, 8
    params = init_params(k_p, n_in, n_mid, n_out)
    prepped = prepare_params(params)   # one-time plumbing, reused across calls

    # bf16 MXU operands => loosened tolerance vs. the f32 reference (expected
    # precision loss per the perf review, not a correctness bug).
    TOL = 5e-2

    # small batch, single grid step
    x = jax.random.normal(k_x, (B, n_in), jnp.float32)
    out = jax.block_until_ready(dueling_net(x, prepped))
    ref = dueling_net_ref(x, params)
    assert out.shape == (B, n_out)
    assert jnp.allclose(out, ref, atol=TOL, rtol=TOL), "mismatch vs reference (B=8)"

    # larger, non-aligned batch exercising padding + a 2-step batch grid
    B2 = 300
    x2 = jax.random.normal(k_x2, (B2, n_in), jnp.float32)
    out2 = jax.block_until_ready(dueling_net(x2, prepped))
    ref2 = dueling_net_ref(x2, params)
    assert out2.shape == (B2, n_out)
    assert jnp.allclose(out2, ref2, atol=TOL, rtol=TOL), "mismatch vs reference (B=300)"

    print("KERNEL_OK")
</pallas_src>

<mosaic_0001>
module attributes {stable_mosaic.version = 11 : i64} {
  func.func @dueling_net_kernel(%arg0: i32, %arg1: memref<16x128xf32, #tpu.memory_space<vmem>>, %arg2: memref<32x16xbf16, #tpu.memory_space<vmem>>, %arg3: memref<32x1xf32, #tpu.memory_space<vmem>>, %arg4: memref<64x32xbf16, #tpu.memory_space<vmem>>, %arg5: memref<64x1xf32, #tpu.memory_space<vmem>>, %arg6: memref<16x64xbf16, #tpu.memory_space<vmem>>, %arg7: memref<16x1xf32, #tpu.memory_space<vmem>>, %arg8: memref<8x128xf32, #tpu.memory_space<vmem>>) attributes {dimension_semantics = [#tpu.dimension_semantics<parallel>], iteration_bounds = array<i64: 1>, scalar_prefetch = 0 : i64, scratch_operands = 0 : i64, tpu.core_type = #tpu.core_type<tc>, window_params = [{transform_indices = @transform_0, window_bounds = array<i64: 16, 128>}, {pipeline_mode = #tpu.pipeline_mode<synchronous>, transform_indices = @transform_1, window_bounds = array<i64: 32, 16>}, {pipeline_mode = #tpu.pipeline_mode<synchronous>, transform_indices = @transform_2, window_bounds = array<i64: 32, 1>}, {pipeline_mode = #tpu.pipeline_mode<synchronous>, transform_indices = @transform_3, window_bounds = array<i64: 64, 32>}, {pipeline_mode = #tpu.pipeline_mode<synchronous>, transform_indices = @transform_4, window_bounds = array<i64: 64, 1>}, {pipeline_mode = #tpu.pipeline_mode<synchronous>, transform_indices = @transform_5, window_bounds = array<i64: 16, 64>}, {pipeline_mode = #tpu.pipeline_mode<synchronous>, transform_indices = @transform_6, window_bounds = array<i64: 16, 1>}, {transform_indices = @transform_7, window_bounds = array<i64: 8, 128>}]} {
    %c0 = arith.constant 0 : index
    %c0_0 = arith.constant 0 : index
    %0 = vector.load %arg1[%c0, %c0_0] : memref<16x128xf32, #tpu.memory_space<vmem>>, vector<16x128xf32>
    %1 = arith.truncf %0 : vector<16x128xf32> to vector<16x128xbf16>
    %c0_1 = arith.constant 0 : index
    %c0_2 = arith.constant 0 : index
    %2 = vector.load %arg2[%c0_1, %c0_2] : memref<32x16xbf16, #tpu.memory_space<vmem>>, vector<32x16xbf16>
    %cst = arith.constant dense<0.000000e+00> : vector<32x128xf32>
    %3 = tpu.matmul %2, %1, %cst {dimension_numbers = #tpu.dot_dimension_numbers<[1], [0], [0], [1], [0, 0, 1, 1], [], []>} : vector<32x16xbf16>, vector<16x128xbf16>, vector<32x128xf32> -> vector<32x128xf32>
    %c0_3 = arith.constant 0 : index
    %c0_4 = arith.constant 0 : index
    %4 = vector.load %arg3[%c0_3, %c0_4] : memref<32x1xf32, #tpu.memory_space<vmem>>, vector<32x1xf32>
    %5 = vector.broadcast %4 : vector<32x1xf32> to vector<32x128xf32>
    %6 = arith.addf %3, %5 : vector<32x128xf32>
    %cst_5 = arith.constant 0.000000e+00 : f32
    %7 = vector.broadcast %cst_5 : f32 to vector<32x128xf32>
    %8 = arith.maximumf %6, %7 : vector<32x128xf32>
    %c0_6 = arith.constant 0 : index
    %c0_7 = arith.constant 0 : index
    %9 = vector.load %arg4[%c0_6, %c0_7] : memref<64x32xbf16, #tpu.memory_space<vmem>>, vector<64x32xbf16>
    %10 = arith.truncf %8 : vector<32x128xf32> to vector<32x128xbf16>
    %cst_8 = arith.constant dense<0.000000e+00> : vector<64x128xf32>
    %11 = tpu.matmul %9, %10, %cst_8 {dimension_numbers = #tpu.dot_dimension_numbers<[1], [0], [0], [1], [0, 0, 1, 1], [], []>} : vector<64x32xbf16>, vector<32x128xbf16>, vector<64x128xf32> -> vector<64x128xf32>
    %c0_9 = arith.constant 0 : index
    %c0_10 = arith.constant 0 : index
    %12 = vector.load %arg5[%c0_9, %c0_10] : memref<64x1xf32, #tpu.memory_space<vmem>>, vector<64x1xf32>
    %13 = vector.broadcast %12 : vector<64x1xf32> to vector<64x128xf32>
    %14 = arith.addf %11, %13 : vector<64x128xf32>
    %cst_11 = arith.constant 0.000000e+00 : f32
    %15 = vector.broadcast %cst_11 : f32 to vector<64x128xf32>
    %16 = arith.maximumf %14, %15 : vector<64x128xf32>
    %c0_12 = arith.constant 0 : index
    %c0_13 = arith.constant 0 : index
    %17 = vector.load %arg6[%c0_12, %c0_13] : memref<16x64xbf16, #tpu.memory_space<vmem>>, vector<16x64xbf16>
    %18 = arith.truncf %16 : vector<64x128xf32> to vector<64x128xbf16>
    %cst_14 = arith.constant dense<0.000000e+00> : vector<16x128xf32>
    %19 = tpu.matmul %17, %18, %cst_14 {dimension_numbers = #tpu.dot_dimension_numbers<[1], [0], [0], [1], [0, 0, 1, 1], [], []>} : vector<16x64xbf16>, vector<64x128xbf16>, vector<16x128xf32> -> vector<16x128xf32>
    %c0_15 = arith.constant 0 : index
    %c0_16 = arith.constant 0 : index
    %20 = vector.load %arg7[%c0_15, %c0_16] : memref<16x1xf32, #tpu.memory_space<vmem>>, vector<16x1xf32>
    %21 = vector.broadcast %20 : vector<16x1xf32> to vector<16x128xf32>
    %22 = arith.addf %19, %21 : vector<16x128xf32>
    %23 = vector.extract_strided_slice %22 {offsets = [0, 0], sizes = [8, 128], strides = [1, 1]} : vector<16x128xf32> to vector<8x128xf32>
    %24 = vector.extract_strided_slice %22 {offsets = [8, 0], sizes = [1, 128], strides = [1, 1]} : vector<16x128xf32> to vector<1x128xf32>
    %cst_17 = arith.constant dense<0.000000e+00> : vector<128xf32>
    %25 = vector.multi_reduction <add>, %23, %cst_17 [0] : vector<8x128xf32> to vector<128xf32>
    %26 = vector.shape_cast %25 : vector<128xf32> to vector<1x128xf32>
    %cst_18 = arith.constant 1.250000e-01 : f32
    %27 = vector.broadcast %cst_18 : f32 to vector<1x128xf32>
    %28 = arith.mulf %26, %27 : vector<1x128xf32>
    %29 = vector.broadcast %24 : vector<1x128xf32> to vector<8x128xf32>
    %30 = arith.addf %29, %23 : vector<8x128xf32>
    %31 = vector.broadcast %28 : vector<1x128xf32> to vector<8x128xf32>
    %32 = arith.subf %30, %31 : vector<8x128xf32>
    %c0_19 = arith.constant 0 : index
    %c0_20 = arith.constant 0 : index
    %33 = vector.load %arg8[%c0_19, %c0_20] : memref<8x128xf32, #tpu.memory_space<vmem>>, vector<8x128xf32>
    tpu.vector_store %arg8[%c0_19, %c0_20], %32 {strides = array<i32>} : memref<8x128xf32, #tpu.memory_space<vmem>>, vector<8x128xf32>,
    return
  }
  func.func @transform_0(%arg0: i32) -> (i32, i32) {
    %c0_i32 = arith.constant 0 : i32
    %c0_i32_0 = arith.constant 0 : i32
    return %c0_i32, %arg0 : i32, i32
  }
  func.func @transform_1(%arg0: i32) -> (i32, i32) {
    %c0_i32 = arith.constant 0 : i32
    %c0_i32_0 = arith.constant 0 : i32
    %c0_i32_1 = arith.constant 0 : i32
    return %c0_i32, %c0_i32_0 : i32, i32
  }
  func.func @transform_2(%arg0: i32) -> (i32, i32) {
    %c0_i32 = arith.constant 0 : i32
    %c0_i32_0 = arith.constant 0 : i32
    %c0_i32_1 = arith.constant 0 : i32
    return %c0_i32, %c0_i32_0 : i32, i32
  }
  func.func @transform_3(%arg0: i32) -> (i32, i32) {
    %c0_i32 = arith.constant 0 : i32
    %c0_i32_0 = arith.constant 0 : i32
    %c0_i32_1 = arith.constant 0 : i32
    return %c0_i32, %c0_i32_0 : i32, i32
  }
  func.func @transform_4(%arg0: i32) -> (i32, i32) {
    %c0_i32 = arith.constant 0 : i32
    %c0_i32_0 = arith.constant 0 : i32
    %c0_i32_1 = arith.constant 0 : i32
    return %c0_i32, %c0_i32_0 : i32, i32
  }
  func.func @transform_5(%arg0: i32) -> (i32, i32) {
    %c0_i32 = arith.constant 0 : i32
    %c0_i32_0 = arith.constant 0 : i32
    %c0_i32_1 = arith.constant 0 : i32
    return %c0_i32, %c0_i32_0 : i32, i32
  }
  func.func @transform_6(%arg0: i32) -> (i32, i32) {
    %c0_i32 = arith.constant 0 : i32
    %c0_i32_0 = arith.constant 0 : i32
    %c0_i32_1 = arith.constant 0 : i32
    return %c0_i32, %c0_i32_0 : i32, i32
  }
  func.func @transform_7(%arg0: i32) -> (i32, i32) {
    %c0_i32 = arith.constant 0 : i32
    %c0_i32_0 = arith.constant 0 : i32
    return %c0_i32, %arg0 : i32, i32
  }
}

</mosaic_0001>

<bundles_post_ra>
// kernel: tpu_custom_call.1
= control target key start
LH: loop header
LB: loop body
LE: loop exit
PB: predicated region body
PF: predicated region fallthrough
CT: control target
= control target key end

     0   :  { %vm69_vm0 = vcmask 130048   ;;  %v484_v4 = vmov 0   ;;  %s615_s0 = inlined_call_operand.vmem [shape: f32[16,128], index: 0, kind: input, shape index: {}]   ;;  %s616_s1 = inlined_call_operand.vmem [shape: bf16[32,16], index: 1, kind: input, shape index: {}]   ;;  %s617_s2 = inlined_call_operand.vmem [shape: f32[32,1], index: 2, kind: input, shape index: {}]   ;;  %s618_s3 = inlined_call_operand.vmem [shape: bf16[64,32], index: 3, kind: input, shape index: {}]   ;;  %s619_s4 = inlined_call_operand.vmem [shape: f32[64,1], index: 4, kind: input, shape index: {}]   ;;  %s620_s5 = inlined_call_operand.vmem [shape: bf16[16,64], index: 5, kind: input, shape index: {}]   ;;  %s621_s6 = inlined_call_operand.vmem [shape: f32[16,1], index: 6, kind: input, shape index: {}]   ;;  %s622_s7 = inlined_call_operand.hbm [shape: f32[8,128], index: 7, kind: output, shape index: {}]  }
   0x1   :  { %v28_v0 = vld [vmem:[%s615_s0] sm:$0xff]  ;;  %v29_v1 = vld [vmem:[%s615_s0 + $0x8] sm:$0xff]  ;;  %451 = vset.pattern.permute.xlu0 %v484_v4  ;;  %452 = vset.pattern.permute.xlu1 %v484_v4  ;;  %v37_v7 = vld [vmem:[%s617_s2 + $0x10] sm:$0xff] }
   0x2   :  { %v30_v2 = vpack.c.bf16 %v29_v1, %v28_v0  ;;  %v453_v3 = vld [vmem:[%s616_s1] sm:$0xff]   ;;  %v454_v6 = vld [vmem:[%s616_s1 + $0x8] sm:$0xff]   ;;  %51 = vperm.xlu1 %452, %v37_v7   ;;  %v38_v9 = vld [vmem:[%s617_s2 + $0x18] sm:$0xff] }
   0x3   :  { %v35_v5 = vld [vmem:[%s617_s2] sm:$0xff]  ;;  %419 = vmatprep.mubr.msk.bf16.mxu0 %vm69_vm0, %v453_v3  ;;  %v36_v8 = vld [vmem:[%s617_s2 + $0x8] sm:$0xff] }
   0x4   :  { %417 = vmatprep.subr.bf16.mxu0 %v30_v2  ;;  %41 = vperm.xlu0 %451, %v35_v5   ;;  %v139_v10 = vld [vmem:[%s619_s4] sm:$0xff]  ;;  %v140_v11 = vld [vmem:[%s619_s4 + $0x8] sm:$0xff] }
   0x5   :  { %418 = vmatpush3.bf16.msra.mxu0 %v30_v2 }
   0x6   :  { %56 = vperm.xlu1 %452, %v38_v9  }
   0x8   :  { %420 = vmatmul.mubr.msk.bf16.vlgmr.msra.gmra.mrb[0].mxu0 %vm69_vm0, %v454_v6  ;;  %46 = vperm.xlu0 %451, %v36_v8  }
   0x9   :  { %12 = vsyncpa [#allocation3], 0  ;;  %v141_v12 = vld [vmem:[%s619_s4 + $0x10] sm:$0xff]  ;;  %v142_v13 = vld [vmem:[%s619_s4 + $0x18] sm:$0xff]  ;;  %vm207_vm1 = vcmask 261120   ;;  %v485_v42 = vmov 0.0  }
   0xa   :  { %154 = vperm.xlu1 %452, %v140_v11   ;;  %v143_v14 = vld [vmem:[%s619_s4 + $0x20] sm:$0xff]  ;;  %v144_v15 = vld [vmem:[%s619_s4 + $0x28] sm:$0xff]  ;;  %v145_v16 = vld [vmem:[%s619_s4 + $0x30] sm:$0xff]  ;;  %435 = vmatprep.subr.bf16.mxu0 %v485_v42  ;;  %vm486_vm2 = vmmov 0   ;;  %vm316_vm3 = vcmask 523264  }
   0xb   :  { %v146_v17 = vld [vmem:[%s619_s4 + $0x38] sm:$0xff]  ;;  %v299_v18 = vld [vmem:[%s621_s6] sm:$0xff]  ;;  %v300_v19 = vld [vmem:[%s621_s6 + $0x8] sm:$0xff]  ;;  %443 = vmatprep.mubr.msk.bf16.mxu0 %vm486_vm2, %v485_v42 }
   0xc   :  { %149 = vperm.xlu0 %451, %v139_v10   ;;  %v455_v20 = vld [vmem:[%s618_s3] sm:$0xff]   ;;  %v456_v39 = vld [vmem:[%s618_s3 + $0x8] sm:$0xff]   ;;  %v457_v40 = vld [vmem:[%s618_s3 + $0x10] sm:$0xff]  }
   0xd   :  { %427 = vmatprep.mubr.msk.bf16.mxu1 %vm207_vm1, %v455_v20  ;;  %v458_v41 = vld [vmem:[%s618_s3 + $0x18] sm:$0xff]  }
   0xe   :  { %164 = vperm.xlu1 %452, %v142_v13  }
  0x10   :  { %159 = vperm.xlu0 %451, %v141_v12  }
  0x12   :  { %174 = vperm.xlu1 %452, %v144_v15   ;;  %v459_v15 = vld [vmem:[%s620_s5] sm:$0xff]   ;;  %s487_s5 = smov [#allocation2]  }
  0x13   :  { %s381_s17 = sshll.u32 %s487_s5, 4  ;;  %s382_s17 = int_to_ptr.vmem [resolvable:$true] %s381_s17 }
  0x14   :  { %169 = vperm.xlu0 %451, %v143_v14   ;;  %s460_s1 = scalar_lea.vmem %s382_s17, 128  ;;  %p465_p1 = scmp.lt.s32.totalorder %s382_s17, %s382_s17 }
  0x15   :  { %p461_p0 = scmp.ne.s32.totalorder %s382_s17, %s460_s1  ;;  %p466_p2 = scmp.lt.s32.totalorder %s460_s1, %s460_s1 }
  0x16   :  { %184 = vperm.xlu1 %452, %v146_v17  }
  0x17   :  { %p467_p3 = por %p466_p2, %p465_p1 }
  0x18   :  { %179 = vperm.xlu0 %451, %v145_v16   ;;  %v368_v16 = vlaneseq }
  0x19   :  { %p468_p4 = pnand %p467_p3, %p461_p0 }
  0x1a   :  { %308 = vperm.xlu1 %452, %v300_v19   ;;  %v369_v17 = vshrl.u32 %v368_v16, 7 }
  0x1c   :  { %303 = vperm.xlu0 %451, %v299_v18  }
  0x81   :  { %v52_v21 = vpop.permute.xlu1 %51 }
  0x83   :  { %v42_v22 = vpop.permute.xlu0 %41 }
  0x85   :  { %v57_v26 = vpop.permute.xlu1 %56 }
  0x87   :  { %v47_v29 = vpop.permute.xlu0 %46 }
  0x89   :  { %v155_v44 = vpop.permute.xlu1 %154 }
  0x8b   :  { %v150_v43 = vpop.permute.xlu0 %149 }
  0x8d   :  { %v165_v46 = vpop.permute.xlu1 %164 }
  0x8f   :  { %v160_v45 = vpop.permute.xlu0 %159 }
  0x91   :  { %v175_v55 = vpop.permute.xlu1 %174 }
  0x93   :  { %v170_v50 = vpop.permute.xlu0 %169 }
  0x95   :  { %v185_v3 = vpop.permute.xlu1 %184 }
  0x97   :  { %v180_v62 = vpop.permute.xlu0 %179 }
  0x9b   :  { %v304_v18 = vpop.permute.xlu0 %303 }
  0xdb   :  { %v421_v23 = vpop.f32.mrb[0].mxu0 }
  0xdc   :  { %v119_v24 = vadd.f32 %v421_v23, %v52_v21  ;;  %v110_v25 = vpop.f32.mrb[1].mxu0  ;;  %v309_v23 = vpop.permute.xlu1 %308 }
  0xdd   :  { %v111_v27 = vadd.f32 %v110_v25, %v42_v22  ;;  %v422_v28 = vpop.f32.mrb[2].mxu0  ;;  %v370_v22 = vsub.s32 0, %v369_v17 }
  0xde   :  { %v122_v30 = vadd.f32 %v422_v28, %v57_v26  ;;  %v113_v31 = vpop.f32.mrb[3].mxu0  ;;  %v127_v33 = vmax.f32 %v119_v24, 0.0 }
  0xdf   :  { %v114_v32 = vadd.f32 %v113_v31, %v47_v29  ;;  %v125_v35 = vmax.f32 %v111_v27, 0.0 }
  0xe0   :  { %v128_v34 = vmax.f32 %v122_v30, 0.0 }
  0xe1   :  { %v126_v36 = vmax.f32 %v114_v32, 0.0 }
  0xe2   :  { %v138_v37 = vpack.c.bf16 %v128_v34, %v127_v33 }
  0xe3   :  { %v137_v38 = vpack.c.bf16 %v126_v36, %v125_v35 }
  0xe5   :  { %423 = vmatprep.subr.bf16.mxu1 %v137_v38 }
  0xe6   :  { %424 = vmatpush3.bf16.msra.mxu1 %v137_v38 }
  0xe7   :  { %425 = vmatprep.subr.bf16.mxu1 %v138_v37 }
  0xea   :  { %426 = vmatpush3.bf16.msra.mxu1 %v138_v37 }
  0xed   :  { %428 = vmatmul.mubr.msk.bf16.vlgmr.msra.gmra.mrb[0].mxu1 %vm207_vm1, %v456_v39 }
  0xee   :  { %431 = vmatprep.mubr.msk.bf16.mxu1 %vm207_vm1, %v457_v40 }
  0xf5   :  { %432 = vmatmul.mubr.msk.bf16.gmra.mrb[4].mxu1 %vm207_vm1, %v458_v41 }
 0x1c0   :  { %v429_v47 = vpop.f32.mrb[0].mxu1 }
 0x1c1   :  { %v263_v48 = vadd.f32 %v429_v47, %v160_v45  ;;  %v254_v49 = vpop.f32.mrb[1].mxu1 }
 0x1c2   :  { %v255_v51 = vadd.f32 %v254_v49, %v150_v43  ;;  %v430_v52 = vpop.f32.mrb[2].mxu1 }
 0x1c3   :  { %v266_v53 = vadd.f32 %v430_v52, %v165_v46  ;;  %v257_v54 = vpop.f32.mrb[3].mxu1  ;;  %v287_v57 = vmax.f32 %v263_v48, 0.0 }
 0x1c4   :  { %v258_v56 = vadd.f32 %v257_v54, %v155_v44  ;;  %v285_v59 = vmax.f32 %v255_v51, 0.0 }
 0x1c5   :  { %v288_v58 = vmax.f32 %v266_v53, 0.0 }
 0x1c6   :  { %v286_v60 = vmax.f32 %v258_v56, 0.0 }
 0x1c7   :  { %v296_v61 = vpack.c.bf16 %v288_v58, %v287_v57 }
 0x1c8   :  { %v295_v63 = vpack.c.bf16 %v286_v60, %v285_v59  ;;  %v433_v0 = vpop.f32.mrb[4].mxu1 }
 0x1c9   :  { %v279_v1 = vadd.f32 %v433_v0, %v180_v62  ;;  %v270_v2 = vpop.f32.mrb[5].mxu1 }
 0x1ca   :  { %v271_v4 = vadd.f32 %v270_v2, %v170_v50  ;;  %v434_v5 = vpop.f32.mrb[6].mxu1  ;;  %436 = vmatpush3.bf16.msra.mxu0 %v295_v63 }
 0x1cb   :  { %v282_v6 = vadd.f32 %v434_v5, %v185_v3  ;;  %v273_v7 = vpop.f32.mrb[7].mxu1  ;;  %437 = vmatprep.subr.bf16.mxu0 %v485_v42  ;;  %v291_v9 = vmax.f32 %v279_v1, 0.0 }
 0x1cc   :  { %v274_v8 = vadd.f32 %v273_v7, %v175_v55  ;;  %v289_v11 = vmax.f32 %v271_v4, 0.0 }
 0x1cd   :  { %v292_v10 = vmax.f32 %v282_v6, 0.0 }
 0x1ce   :  { %v290_v12 = vmax.f32 %v274_v8, 0.0  ;;  %438 = vmatpush3.bf16.msra.mxu0 %v296_v61 }
 0x1cf   :  { %v298_v13 = vpack.c.bf16 %v292_v10, %v291_v9  ;;  %439 = vmatprep.subr.bf16.mxu0 %v485_v42 }
 0x1d0   :  { %v297_v14 = vpack.c.bf16 %v290_v12, %v289_v11 }
 0x1d2   :  { %440 = vmatpush3.bf16.msra.mxu0 %v297_v14 }
 0x1d3   :  { %441 = vmatprep.subr.bf16.mxu0 %v485_v42 }
 0x1d6   :  { %442 = vmatpush3.bf16.msra.mxu0 %v298_v13 }
 0x1d9   :  { %444 = vmatmul.mubr.msk.bf16.vlgmr.msra.gmra.mrb[4].mxu0 %vm316_vm3, %v459_v15 }
 0x2ac   :  { %v354_v19 = vpop.f32.mrb[4].mxu0 }
 0x2ad   :  { %v355_v20 = vadd.f32 %v354_v19, %v304_v18  ;;  %v445_v21 = vpop.f32.mrb[5].mxu0 }
 0x2ae   :  { %v357_v24 = vpop.f32.mrb[6].mxu0 }
 0x2af   :  { %v361_v25 = vrot.slane %v355_v20, 4  ;;  %v358_v26 = vadd.f32 %v357_v24, %v309_v23  ;;  %v446_v27 = vpop.f32.mrb[7].mxu0 }
 0x2b1   :  { %v362_v28 = vadd.f32 %v361_v25, %v355_v20  ;;  %v371_v29 = vrot.slane %v358_v26, %v370_v22 }
 0x2b3   :  { %v363_v30 = vrot.slane %v362_v28, 2  ;;  %v372_v31 = vadd.f32 %v371_v29, %v355_v20 }
 0x2b5   :  { %v364_v32 = vadd.f32 %v363_v30, %v362_v28 }
 0x2b7   :  { %v365_v33 = vrot.slane %v364_v32, 1 }
 0x2b9   :  { %v366_v34 = vadd.f32 %v365_v33, %v364_v32 }
 0x2bb   :  { %v367_v35 = vmul.f32 0.125, %v366_v34 }
 0x2bd   :  { %v373_v36 = vsub.f32 %v372_v31, %v367_v35 }
 0x2bf   :  { %374 = vst [vmem:[#allocation2] sm:$0xff] %v373_v36 }
 0x2c0   :  { %471 = shalt.err (!%p468_p4)
}
 0x2c1   :  { %s472_s20 = scalar_lea.hbm %s622_s7, 128 }
 0x2c2   :  { %p473_p5 = scmp.ne.s32.totalorder %s622_s7, %s472_s20  ;;  %p476_p6 = scmp.lt.u32.totalorder %s472_s20, %s622_s7 }
 0x2c4   :  { %p478_p7 = pnand %p476_p6, %p473_p5 }
 0x2c6   :  { %481 = shalt.err (!%p478_p7)
}
 0x2c7   :  { %384 = dma.vmem_to_hbm [thread:$0]  %s382_s17, 128, %s622_s7, [#allocation3]  }
 0x2c8   :  { %482 = dma.done.wait [#allocation3], 128  }
 0x2c9   :  { %483 = vsyncadd [#allocation3], 4294967168 }
 0x2ca   :  { %388 = vsyncpa [#allocation3], 1 }

</bundles_post_ra>
